<compile_context>
chip_gen: v5e
topology: v5e:2x2
jax: 0.10.0
libtpu: 0.0.40
codegen_flags: <defaults>
</compile_context>

<pallas_src>
import functools

import jax
import jax.numpy as jnp
from jax.experimental import pallas as pl
from jax.experimental.pallas import tpu as pltpu

EPS = 1e-8  # torch.nn.CosineSimilarity default eps


# ----------------------------------------------------------------------------
# Pallas kernel: masked seq-mean + cosine similarity
# ----------------------------------------------------------------------------
def _cos_kernel(q_ref, e_ref, mq_ref, me_ref, cos_ref, qacc_ref, eacc_ref,
                *, inv_seq_len):
    # q_ref/e_ref : (BT, TS, H) bf16 hidden-state tiles
    # mq_ref/me_ref: (1, 1, BT, TS) bf16 mask tiles (lane-dense along TS)
    # cos_ref     : (1, BT, 128) f32 lane-dense output slab
    # qacc_ref/eacc_ref: (BT, H) f32 accumulators (persist across seq tiles)
    k = pl.program_id(1)

    @pl.when(k == 0)
    def _init():
        qacc_ref[...] = jnp.zeros_like(qacc_ref)
        eacc_ref[...] = jnp.zeros_like(eacc_ref)

    mq = mq_ref[0, 0]  # (BT, TS) bf16
    me = me_ref[0, 0]

    # Masked partial sums as batched (1, TS) @ (TS, H) matmuls on the MXU,
    # accumulated in f32.  Mask values are 0/1 so bf16 is exact; no full-tile
    # f32 upcast / VPU multiply / XLU sublane reduce.
    qacc_ref[...] += jnp.einsum(
        'bqs,bsh->bqh', mq[:, None, :], q_ref[...],
        preferred_element_type=jnp.float32)[:, 0, :]
    eacc_ref[...] += jnp.einsum(
        'bqs,bsh->bqh', me[:, None, :], e_ref[...],
        preferred_element_type=jnp.float32)[:, 0, :]

    @pl.when(k == pl.num_programs(1) - 1)
    def _finalize():
        # mean over the full sequence length (matches q.mean(dim=1) in torch)
        qm = qacc_ref[...] * inv_seq_len                     # (BT, H)
        em = eacc_ref[...] * inv_seq_len
        num = jnp.sum(qm * em, axis=1, keepdims=True)        # (BT, 1)
        qn = jnp.sqrt(jnp.sum(qm * qm, axis=1, keepdims=True))
        en = jnp.sqrt(jnp.sum(em * em, axis=1, keepdims=True))
        # torch.nn.CosineSimilarity clamps each norm separately; exact divide
        # (the approx reciprocal runs once per tile on 8 values: no benefit).
        den = jnp.maximum(qn, EPS) * jnp.maximum(en, EPS)
        cos = num / den                                      # (BT, 1)
        cos_ref[...] = jnp.broadcast_to(cos[None, :, :], cos_ref.shape)


# ----------------------------------------------------------------------------
# Tiling heuristics
# ----------------------------------------------------------------------------
def _vmem_budgets():
    """(per-hidden-block byte budget, scoped vmem limit), by TPU generation."""
    kind = ""
    try:
        kind = jax.devices()[0].device_kind.lower()
    except Exception:
        pass
    if "v5" in kind or "v6" in kind:
        # 128 MiB physical VMEM per TensorCore -> larger tiles, higher limit.
        return 6 * 1024 * 1024, 64 * 1024 * 1024
    # v7x (64 MiB physical VMEM) and unknown chips: conservative settings.
    return 4 * 1024 * 1024, 32 * 1024 * 1024


def _pick_batch_tile(B):
    """Largest divisor of B that is <= 8 while leaving >= 2 batch blocks when
    possible (so the 'parallel' grid axis can shard across 2 TensorCores)."""
    upper = min(8, max(1, B // 2))
    for bt in range(upper, 0, -1):
        if B % bt == 0:
            return bt
    return 1


def _pick_seq_tile(S, BT, H, itemsize, budget):
    """Largest divisor of S that is a multiple of 8 (or == S) whose
    (BT, TS, H) hidden block fits `budget`; if none fit, the smallest valid
    divisor (graceful degradation instead of a VMEM-limit compile failure)."""
    cands = [d for d in range(8, S + 1, 8) if S % d == 0]
    if S not in cands:
        cands.append(S)
    fitting = [d for d in cands if BT * d * H * itemsize <= budget]
    return max(fitting) if fitting else min(cands)


# ----------------------------------------------------------------------------
# Wrapper
# ----------------------------------------------------------------------------
def masked_mean_cosine(q_hidden, e_hidden, mask_q, mask_e, *, seq_tile=None):
    """q_hidden/e_hidden: (B, S, H) bf16/f32; mask_q/mask_e: (B, S).
    Returns cosine similarity of the masked sequence-means, shape (B,) f32."""
    B, S, H = q_hidden.shape
    itemsize = jnp.dtype(q_hidden.dtype).itemsize
    budget, vmem_limit = _vmem_budgets()

    BT = _pick_batch_tile(B)
    TS = seq_tile if seq_tile is not None else _pick_seq_tile(
        S, BT, H, itemsize, budget)
    assert B % BT == 0, (B, BT)
    assert S % TS == 0 and (TS == S or TS % 8 == 0), (S, TS)

    nb, nk = B // BT, S // TS

    # Masks: bf16, pre-tiled to (nb, nk, BT, TS) so every grid step gets a
    # tiny lane-dense (BT, TS) tile with a contiguous DMA.
    def tile_mask(m):
        m = m.astype(jnp.bfloat16).reshape(nb, BT, nk, TS)
        return m.transpose(0, 2, 1, 3)                       # (nb, nk, BT, TS)

    mq = tile_mask(mask_q)
    me = tile_mask(mask_e)

    hid_spec = pl.BlockSpec((BT, TS, H), lambda b, k: (b, k, 0))
    msk_spec = pl.BlockSpec((1, 1, BT, TS), lambda b, k: (b, k, 0, 0))
    out_spec = pl.BlockSpec((1, BT, 128), lambda b, k: (b, 0, 0))

    kernel = functools.partial(_cos_kernel, inv_seq_len=1.0 / S)

    cost = pl.CostEstimate(
        flops=4 * B * S * H + 8 * B * H,
        transcendentals=2 * B,
        bytes_accessed=2 * B * S * H * itemsize + 2 * B * S * 2 + B * 128 * 4,
    )

    cos_slab = pl.pallas_call(
        kernel,
        out_shape=jax.ShapeDtypeStruct((nb, BT, 128), jnp.float32),
        grid_spec=pltpu.PrefetchScalarGridSpec(
            num_scalar_prefetch=0,
            grid=(nb, nk),
            in_specs=[hid_spec, hid_spec, msk_spec, msk_spec],
            out_specs=out_spec,
            scratch_shapes=[pltpu.VMEM((BT, H), jnp.float32),
                            pltpu.VMEM((BT, H), jnp.float32)],
        ),
        compiler_params=pltpu.CompilerParams(
            dimension_semantics=("parallel", "arbitrary"),
            vmem_limit_bytes=vmem_limit,
        ),
        cost_estimate=cost,
    )(q_hidden, e_hidden, mq, me)
    return cos_slab.reshape(B, 128)[:, 0]


# ----------------------------------------------------------------------------
# Synthetic frozen "embedder" (plain-JAX glue; stands in for AutoModel)
# ----------------------------------------------------------------------------
def make_embedder_params(key, vocab, hidden):
    k1, k2, k3 = jax.random.split(key, 3)
    table = jax.random.normal(k1, (vocab, hidden), jnp.float32) * 0.1
    w = jax.random.normal(k2, (hidden, hidden), jnp.float32) * 0.1
    b = jax.random.normal(k3, (hidden,), jnp.float32) * 0.01
    return table, w, b


def embedder(params, input_ids):
    table, w, b = params
    h = table[input_ids]                               # (B, S, H) gather
    # real encoders emit bf16 activations; feed bf16 into the kernel
    return jnp.tanh(h @ w + b).astype(jnp.bfloat16)    # "last_hidden_state"


def model_forward(params, query, evidence):
    q_hidden = embedder(params, query["input_ids"])
    e_hidden = embedder(params, evidence["input_ids"])
    # force a sub-sequence tile at these toy shapes so the multi-step
    # accumulation / pl.when init+finalize path is exercised
    return masked_mean_cosine(q_hidden, e_hidden,
                              query["attention_mask"],
                              evidence["attention_mask"],
                              seq_tile=8)


def _reference(params, query, evidence):
    """Pure-JAX reference mirroring the PyTorch forward (same bf16 hiddens)."""
    q = embedder(params, query["input_ids"]).astype(jnp.float32)
    e = embedder(params, evidence["input_ids"]).astype(jnp.float32)
    q = q * query["attention_mask"].astype(jnp.float32)[:, :, None]
    e = e * evidence["attention_mask"].astype(jnp.float32)[:, :, None]
    qm = q.mean(axis=1)
    em = e.mean(axis=1)
    num = jnp.sum(qm * em, axis=1)
    qn = jnp.maximum(jnp.linalg.norm(qm, axis=1), EPS)
    en = jnp.maximum(jnp.linalg.norm(em, axis=1), EPS)
    return num / (qn * en)


if __name__ == "__main__":
    B, S, H, V = 2, 16, 32, 50
    key = jax.random.PRNGKey(0)
    kp, kq, ke, kmq, kme = jax.random.split(key, 5)

    params = make_embedder_params(kp, V, H)

    query = {
        "input_ids": jax.random.randint(kq, (B, S), 0, V, dtype=jnp.int32),
        "attention_mask": (jax.random.uniform(kmq, (B, S)) > 0.25).astype(jnp.int32),
    }
    evidence = {
        "input_ids": jax.random.randint(ke, (B, S), 0, V, dtype=jnp.int32),
        "attention_mask": (jax.random.uniform(kme, (B, S)) > 0.25).astype(jnp.int32),
    }

    out = jax.block_until_ready(model_forward(params, query, evidence))
    ref = _reference(params, query, evidence)
    assert out.shape == (B,), out.shape
    # exact finalize math (no approx reciprocal) -> tight tolerance
    assert jnp.allclose(out, ref, atol=1e-5, rtol=1e-5), (out, ref)
    print("KERNEL_OK")
</pallas_src>

<mosaic_0001>
module attributes {stable_mosaic.version = 11 : i64} {
  func.func @_cos_kernel(%arg0: i32, %arg1: i32, %arg2: memref<1x8x32xbf16, #tpu.memory_space<vmem>>, %arg3: memref<1x8x32xbf16, #tpu.memory_space<vmem>>, %arg4: memref<1x1x1x8xbf16, #tpu.memory_space<vmem>>, %arg5: memref<1x1x1x8xbf16, #tpu.memory_space<vmem>>, %arg6: memref<1x1x128xf32, #tpu.memory_space<vmem>>, %arg7: memref<1x32xf32, #tpu.memory_space<vmem>>, %arg8: memref<1x32xf32, #tpu.memory_space<vmem>>) attributes {dimension_semantics = [#tpu.dimension_semantics<parallel>, #tpu.dimension_semantics<arbitrary>], iteration_bounds = array<i64: 2, 2>, scalar_prefetch = 0 : i64, scratch_operands = 2 : i64, tpu.core_type = #tpu.core_type<tc>, window_params = [{transform_indices = @transform_0, window_bounds = array<i64: 1, 8, 32>}, {transform_indices = @transform_1, window_bounds = array<i64: 1, 8, 32>}, {transform_indices = @transform_2, window_bounds = array<i64: 1, 1, 1, 8>}, {transform_indices = @transform_3, window_bounds = array<i64: 1, 1, 1, 8>}, {transform_indices = @transform_4, window_bounds = array<i64: 1, 1, 128>}]} {
    %c0_i32 = arith.constant 0 : i32
    %0 = arith.cmpi eq, %arg1, %c0_i32 : i32
    %1 = arith.extui %0 : i1 to i32
    %c0_i32_0 = arith.constant 0 : i32
    %2 = arith.cmpi ne, %1, %c0_i32_0 : i32
    scf.if %2 {
      %cst_24 = arith.constant 0.000000e+00 : f32
      %24 = vector.broadcast %cst_24 : f32 to vector<1x32xf32>
      %c0_25 = arith.constant 0 : index
      %c0_26 = arith.constant 0 : index
      %25 = vector.load %arg7[%c0_25, %c0_26] : memref<1x32xf32, #tpu.memory_space<vmem>>, vector<1x32xf32>
      tpu.vector_store %arg7[%c0_25, %c0_26], %24 {strides = array<i32>} : memref<1x32xf32, #tpu.memory_space<vmem>>, vector<1x32xf32>,
      %cst_27 = arith.constant 0.000000e+00 : f32
      %26 = vector.broadcast %cst_27 : f32 to vector<1x32xf32>
      %c0_28 = arith.constant 0 : index
      %c0_29 = arith.constant 0 : index
      %27 = vector.load %arg8[%c0_28, %c0_29] : memref<1x32xf32, #tpu.memory_space<vmem>>, vector<1x32xf32>
      tpu.vector_store %arg8[%c0_28, %c0_29], %26 {strides = array<i32>} : memref<1x32xf32, #tpu.memory_space<vmem>>, vector<1x32xf32>,
    } else {
    }
    %c0 = arith.constant 0 : index
    %c0_1 = arith.constant 0 : index
    %c0_2 = arith.constant 0 : index
    %c0_3 = arith.constant 0 : index
    %3 = vector.load %arg4[%c0, %c0_1, %c0_2, %c0_3] : memref<1x1x1x8xbf16, #tpu.memory_space<vmem>>, vector<1x1x1x8xbf16>
    %4 = vector.shape_cast %3 : vector<1x1x1x8xbf16> to vector<1x8xbf16>
    %c0_4 = arith.constant 0 : index
    %c0_5 = arith.constant 0 : index
    %c0_6 = arith.constant 0 : index
    %c0_7 = arith.constant 0 : index
    %5 = vector.load %arg5[%c0_4, %c0_5, %c0_6, %c0_7] : memref<1x1x1x8xbf16, #tpu.memory_space<vmem>>, vector<1x1x1x8xbf16>
    %6 = vector.shape_cast %5 : vector<1x1x1x8xbf16> to vector<1x8xbf16>
    %c0_8 = arith.constant 0 : index
    %c0_9 = arith.constant 0 : index
    %7 = vector.load %arg7[%c0_8, %c0_9] : memref<1x32xf32, #tpu.memory_space<vmem>>, vector<1x32xf32>
    %8 = vector.shape_cast %4 : vector<1x8xbf16> to vector<1x1x8xbf16>
    %c0_10 = arith.constant 0 : index
    %c0_11 = arith.constant 0 : index
    %c0_12 = arith.constant 0 : index
    %9 = vector.load %arg2[%c0_10, %c0_11, %c0_12] : memref<1x8x32xbf16, #tpu.memory_space<vmem>>, vector<1x8x32xbf16>
    "tpu.trace_start"() <{level = 10 : i32, message = "bqs,bsh->bqh"}> : () -> ()
    %cst = arith.constant dense<0.000000e+00> : vector<1x1x32xf32>
    %10 = tpu.matmul %8, %9, %cst {dimension_numbers = #tpu.dot_dimension_numbers<[2], [1], [1], [2], [0, 0, 0, 1, 1, 2], [0], [0]>} : vector<1x1x8xbf16>, vector<1x8x32xbf16>, vector<1x1x32xf32> -> vector<1x1x32xf32>
    "tpu.trace_stop"() : () -> ()
    %11 = vector.shape_cast %10 : vector<1x1x32xf32> to vector<1x32xf32>
    %12 = arith.addf %7, %11 : vector<1x32xf32>
    %c0_13 = arith.constant 0 : index
    %c0_14 = arith.constant 0 : index
    %13 = vector.load %arg7[%c0_13, %c0_14] : memref<1x32xf32, #tpu.memory_space<vmem>>, vector<1x32xf32>
    tpu.vector_store %arg7[%c0_13, %c0_14], %12 {strides = array<i32>} : memref<1x32xf32, #tpu.memory_space<vmem>>, vector<1x32xf32>,
    %c0_15 = arith.constant 0 : index
    %c0_16 = arith.constant 0 : index
    %14 = vector.load %arg8[%c0_15, %c0_16] : memref<1x32xf32, #tpu.memory_space<vmem>>, vector<1x32xf32>
    %15 = vector.shape_cast %6 : vector<1x8xbf16> to vector<1x1x8xbf16>
    %c0_17 = arith.constant 0 : index
    %c0_18 = arith.constant 0 : index
    %c0_19 = arith.constant 0 : index
    %16 = vector.load %arg3[%c0_17, %c0_18, %c0_19] : memref<1x8x32xbf16, #tpu.memory_space<vmem>>, vector<1x8x32xbf16>
    "tpu.trace_start"() <{level = 10 : i32, message = "bqs,bsh->bqh"}> : () -> ()
    %cst_20 = arith.constant dense<0.000000e+00> : vector<1x1x32xf32>
    %17 = tpu.matmul %15, %16, %cst_20 {dimension_numbers = #tpu.dot_dimension_numbers<[2], [1], [1], [2], [0, 0, 0, 1, 1, 2], [0], [0]>} : vector<1x1x8xbf16>, vector<1x8x32xbf16>, vector<1x1x32xf32> -> vector<1x1x32xf32>
    "tpu.trace_stop"() : () -> ()
    %18 = vector.shape_cast %17 : vector<1x1x32xf32> to vector<1x32xf32>
    %19 = arith.addf %14, %18 : vector<1x32xf32>
    %c0_21 = arith.constant 0 : index
    %c0_22 = arith.constant 0 : index
    %20 = vector.load %arg8[%c0_21, %c0_22] : memref<1x32xf32, #tpu.memory_space<vmem>>, vector<1x32xf32>
    tpu.vector_store %arg8[%c0_21, %c0_22], %19 {strides = array<i32>} : memref<1x32xf32, #tpu.memory_space<vmem>>, vector<1x32xf32>,
    %c1_i32 = arith.constant 1 : i32
    %21 = arith.cmpi eq, %arg1, %c1_i32 : i32
    %22 = arith.extui %21 : i1 to i32
    %c0_i32_23 = arith.constant 0 : i32
    %23 = arith.cmpi ne, %22, %c0_i32_23 : i32
    scf.if %23 {
      %c0_24 = arith.constant 0 : index
      %c0_25 = arith.constant 0 : index
      %24 = vector.load %arg7[%c0_24, %c0_25] : memref<1x32xf32, #tpu.memory_space<vmem>>, vector<1x32xf32>
      %cst_26 = arith.constant 6.250000e-02 : f32
      %25 = vector.broadcast %cst_26 : f32 to vector<1x32xf32>
      %26 = arith.mulf %24, %25 : vector<1x32xf32>
      %c0_27 = arith.constant 0 : index
      %c0_28 = arith.constant 0 : index
      %27 = vector.load %arg8[%c0_27, %c0_28] : memref<1x32xf32, #tpu.memory_space<vmem>>, vector<1x32xf32>
      %cst_29 = arith.constant 6.250000e-02 : f32
      %28 = vector.broadcast %cst_29 : f32 to vector<1x32xf32>
      %29 = arith.mulf %27, %28 : vector<1x32xf32>
      %30 = arith.mulf %26, %29 : vector<1x32xf32>
      %cst_30 = arith.constant dense<0.000000e+00> : vector<1xf32>
      %31 = vector.multi_reduction <add>, %30, %cst_30 [1] : vector<1x32xf32> to vector<1xf32>
      %32 = vector.shape_cast %31 : vector<1xf32> to vector<1x1xf32>
      %33 = arith.mulf %26, %26 : vector<1x32xf32>
      %cst_31 = arith.constant dense<0.000000e+00> : vector<1xf32>
      %34 = vector.multi_reduction <add>, %33, %cst_31 [1] : vector<1x32xf32> to vector<1xf32>
      %35 = vector.shape_cast %34 : vector<1xf32> to vector<1x1xf32>
      %36 = math.sqrt %35 : vector<1x1xf32>
      %37 = arith.mulf %29, %29 : vector<1x32xf32>
      %cst_32 = arith.constant dense<0.000000e+00> : vector<1xf32>
      %38 = vector.multi_reduction <add>, %37, %cst_32 [1] : vector<1x32xf32> to vector<1xf32>
      %39 = vector.shape_cast %38 : vector<1xf32> to vector<1x1xf32>
      %40 = math.sqrt %39 : vector<1x1xf32>
      %cst_33 = arith.constant 9.99999993E-9 : f32
      %41 = vector.broadcast %cst_33 : f32 to vector<1x1xf32>
      %42 = arith.maximumf %36, %41 : vector<1x1xf32>
      %cst_34 = arith.constant 9.99999993E-9 : f32
      %43 = vector.broadcast %cst_34 : f32 to vector<1x1xf32>
      %44 = arith.maximumf %40, %43 : vector<1x1xf32>
      %45 = arith.mulf %42, %44 : vector<1x1xf32>
      %46 = arith.divf %32, %45 : vector<1x1xf32>
      %47 = vector.shape_cast %46 : vector<1x1xf32> to vector<1x1x1xf32>
      %48 = vector.shape_cast %47 : vector<1x1x1xf32> to vector<1x1x1xf32>
      %49 = vector.broadcast %48 : vector<1x1x1xf32> to vector<1x1x128xf32>
      %c0_35 = arith.constant 0 : index
      %c0_36 = arith.constant 0 : index
      %c0_37 = arith.constant 0 : index
      %50 = vector.load %arg6[%c0_35, %c0_36, %c0_37] : memref<1x1x128xf32, #tpu.memory_space<vmem>>, vector<1x1x128xf32>
      tpu.vector_store %arg6[%c0_35, %c0_36, %c0_37], %49 {strides = array<i32>} : memref<1x1x128xf32, #tpu.memory_space<vmem>>, vector<1x1x128xf32>,
    } else {
    }
    return
  }
  func.func @transform_0(%arg0: i32, %arg1: i32) -> (i32, i32, i32) {
    %c0_i32 = arith.constant 0 : i32
    %c0_i32_0 = arith.constant 0 : i32
    return %arg0, %arg1, %c0_i32 : i32, i32, i32
  }
  func.func @transform_1(%arg0: i32, %arg1: i32) -> (i32, i32, i32) {
    %c0_i32 = arith.constant 0 : i32
    %c0_i32_0 = arith.constant 0 : i32
    return %arg0, %arg1, %c0_i32 : i32, i32, i32
  }
  func.func @transform_2(%arg0: i32, %arg1: i32) -> (i32, i32, i32, i32) {
    %c0_i32 = arith.constant 0 : i32
    %c0_i32_0 = arith.constant 0 : i32
    %c0_i32_1 = arith.constant 0 : i32
    return %arg0, %arg1, %c0_i32, %c0_i32_0 : i32, i32, i32, i32
  }
  func.func @transform_3(%arg0: i32, %arg1: i32) -> (i32, i32, i32, i32) {
    %c0_i32 = arith.constant 0 : i32
    %c0_i32_0 = arith.constant 0 : i32
    %c0_i32_1 = arith.constant 0 : i32
    return %arg0, %arg1, %c0_i32, %c0_i32_0 : i32, i32, i32, i32
  }
  func.func @transform_4(%arg0: i32, %arg1: i32) -> (i32, i32, i32) {
    %c0_i32 = arith.constant 0 : i32
    %c0_i32_0 = arith.constant 0 : i32
    %c0_i32_1 = arith.constant 0 : i32
    return %arg0, %c0_i32, %c0_i32_0 : i32, i32, i32
  }
}

</mosaic_0001>

<bundles_post_ra>
// kernel: tpu_custom_call.1
= control target key start
LH: loop header
LB: loop body
LE: loop exit
PB: predicated region body
PF: predicated region fallthrough
CT: control target
= control target key end

     0   :  { %s1153_s0 = inlined_call_operand.hbm [shape: bf16[2,16,32], index: 0, kind: input, shape index: {}]   ;;  %s1154_s1 = inlined_call_operand.hbm [shape: bf16[2,16,32], index: 1, kind: input, shape index: {}]   ;;  %s1155_s2 = inlined_call_operand.vmem [shape: bf16[2,2,1,8], index: 2, kind: input, shape index: {}]   ;;  %s1156_s3 = inlined_call_operand.vmem [shape: bf16[2,2,1,8], index: 3, kind: input, shape index: {}]   ;;  %s1157_s4 = inlined_call_operand.hbm [shape: f32[2,1,128], index: 4, kind: output, shape index: {}]  }
   0x1   :  { %1162 = sst [smem:[#allocation19_spill]] %s1153_s0 }
   0x2   :  { %9 = vsyncpa [#allocation5], 0 }
   0x3   :  { %11 = vsyncpa [#allocation5 + $0x1], 0 }
   0x4   :  { %12 = vsyncpa [#allocation8], 0 }
   0x5   :  { %14 = vsyncpa [#allocation8 + $0x1], 0 }
   0x6   :  { %15 = vsyncpa [#allocation6], 0 }
   0x7   :  { %17 = vsyncpa [#allocation6 + $0x1], 0  ;;  %s947_s15 = smov 0   ;;  %s949_s16 = smov 0  }
   0x8   :  { %s951_s17 = smov 0   ;;  %s953_s18 = smov 0  }
   0x9   :  { %s955_s19 = smov 0   ;;  %s957_s20 = smov 0  }
   0xa   :  { %s959_s21 = smov 0   ;;  %s961_s22 = smov 0  }
   0xb   :  { %s963_s23 = smov 0   ;;  %s965_s24 = smov 0  }
   0xc   :  { %s967_s25 = smov 0  }
   0xd LB: > { %1163 = sst [smem:[#allocation13_spill]] %s911_s23  ;;  %s598_s26 = sadd.s32 4294967295, %s919_s25   ;;  %s919_s25 = sphi %s967_s25, %s23_s25   ;;  %s915_s24 = sphi %s965_s24, %s1180_s24   ;;  %s911_s23 = sphi %s963_s23, %s1179_s23   ;;  %s907_s22 = sphi %s961_s22, %s1178_s22   ;;  %s903_s21 = sphi %s959_s21, %s1177_s21   ;;  %s899_s20 = sphi %s957_s20, %s1186_s20   ;;  %s895_s19 = sphi %s955_s19, %s1185_s19   ;;  %s891_s18 = sphi %s953_s18, %s1184_s18   ;;  %s887_s17 = sphi %s951_s17, %s1183_s17   ;;  %s883_s16 = sphi %s949_s16, %s1182_s16   ;;  %s879_s15 = sphi %s947_s15, %s1181_s15  }
   0xe   : > { %1164 = sst [smem:[#allocation14_spill]] %s915_s24  ;;  %s599_s27 = sadd.s32 4294967294, %s919_s25  }
   0xf   : > { %s32_s28 = sadd.s32 1, %s911_s23  ;;  %s35_s29 = sadd.s32 1, %s915_s24 }
  0x10   : > { %p33_p0 = scmp.ge.s32.totalorder %s32_s28, 2  ;;  %s44_s30 = sadd.s32 1, %s899_s20 }
  0x11   : > { %p51_p1 = scmp.ne.s32.totalorder %s899_s20, %s895_s19  ;;  %p52_p2 = scmp.eq.s32.totalorder %s919_s25, 0 }
  0x12   : > { %s1188_s28 = smov (%p33_p0, %s32_s28), 0  ;;  %s1190_s29 = smov (!%p33_p0, %s35_s29), %s915_s24 }
  0x13   : > { %1165 = sst [smem:[#allocation15_spill]] %s1188_s28  ;;  %s40_s5 = ssub.s32 %s911_s23, %s1188_s28 }
  0x14   : > { %p1013_p3 = por %p52_p2, %p51_p1  ;;  %p37_p4 = scmp.ge.s32.totalorder %s1190_s29, 2 }
  0x15   : > { %p57_p5 = scmp.ne.s32.totalorder %s895_s19, %s891_s18  ;;  %p58_p6 = scmp.eq.s32.totalorder %s598_s26, 0 }
  0x16   : > { %s154_s7 = sadd.s32 1, %s887_s17  ;;  %s1192_s29 = smov (%p37_p4, %s1190_s29), 0 }
  0x17   : > { %1167 = sst [smem:[#allocation16_spill]] %s1192_s29  ;;  %p1021_p7 = por %p58_p6, %p57_p5 }
  0x18   : > { %p164_p8 = scmp.ne.s32.totalorder %s887_s17, %s883_s16  ;;  %s39_s9 = ssub.s32 %s915_s24, %s1192_s29 }
  0x19   : > { %p165_p9 = scmp.eq.s32.totalorder %s598_s26, 3  ;;  %s41_s10 = sor.u32 %s40_s5, %s39_s9 }
  0x1a   : > { %p152_p10 = scmp.eq.s32.totalorder %s39_s9, 0  ;;  %p42_p11 = scmp.eq.s32.totalorder %s41_s10, 0 }
  0x1b   : > { %p1029_p12 = por %p165_p9, %p164_p8  ;;  %p170_p13 = scmp.ne.s32.totalorder %s883_s16, %s879_s15 }
  0x1c   : > { %s1034_s12 = scalar_select %p152_p10, %s887_s17, %s154_s7  }
  0x1d   : > { %s1037_s13 = scalar_select %p42_p11, %s899_s20, %s44_s30  }
  0x1e   : > { %1170 = sst [smem:[#allocation17_spill]] %s1034_s12  ;;  %p171_p0 = scmp.eq.s32.totalorder %s599_s27, 3 }
  0x1f   : > { %1171 = sst [smem:[#allocation18_spill]] %s1037_s13  ;;  %p636_p1 = scmp.lt.s32.totalorder %s919_s25, 4 }
  0x20   : > { %p1042_p2 = por %p171_p0, %p170_p13  ;;  %s191_s18 = sand.u32 1, %s899_s20  }
  0x21   : > { %s602_s26 = sshll.u32 %s191_s18, 2  ;;  %s603_s5 = sshll.u32 %s915_s24, 1 }
  0x22   : > { %s199_s9 = sadd.s32 %s911_s23, %s603_s5  ;;  %s195_s10 = scalar_lea.vmem [#allocation4], %s602_s26 }
  0x23   : > { %s205_s29 = sshll.u32 %s195_s10, 4  ;;  %s604_s28 = sshll.u32 %s199_s9, 2  ;;  %s206_s29 = int_to_ptr.vmem [resolvable:$true] %s205_s29 }
  0x24   : > { %s1173_s0 = sld [smem:[#allocation19_spill]]  ;;  %p1054_p4 = pnand %p636_p1, %p1013_p3 }
  0x25   : > { %p608_p5 = scmp.ge.s32.totalorder %s919_s25, 1  ;;  %s192_s24 = scalar_lea.sflag [#allocation5], %s191_s18 }
  0x26   : > { %p251_p6 = scmp.lt.s32.totalorder %s919_s25, 5  ;;  %s222_s10 = scalar_lea.hbm %s1154_s1, %s604_s28 }
  0x27   : > { %s224_s7 = sshll.u32 %s222_s10, 4  ;;  %s216_s6 = scalar_lea.vmem [#allocation7], %s602_s26  ;;  %s225_s7 = int_to_ptr.hbm [resolvable:$true] %s224_s7 }
  0x28   : > { %p252_p8 = pnand %p608_p5, %p251_p6  ;;  %s226_s30 = sshll.u32 %s216_s6, 4  ;;  %s227_s30 = int_to_ptr.vmem [resolvable:$true] %s226_s30 }
  0x2a   : > { %s201_s13 = scalar_lea.hbm %s1173_s0, %s604_s28  ;;  %s213_s0 = scalar_lea.sflag [#allocation8], %s191_s18 }
  0x2b   : > { %s203_s12 = sshll.u32 %s201_s13, 4  ;;  %255 = sbr.rel (%p252_p8) target bundleno = 396 (0x18c), region = 36  ;;  %s204_s12 = int_to_ptr.hbm [resolvable:$true] %s203_s12 }
  0x2c   : > { %628 = dma.hbm_to_vmem [thread:$0]  (!%p1054_p4), %s204_s12, 64, %s206_s29, %s192_s24  }
  0x2d   : > { %631 = dma.hbm_to_vmem [thread:$0]  (!%p1054_p4), %s225_s7, 64, %s227_s30, %s213_s0  }
  0x2e   : > { %s257_s13 = sand.u32 (!%p252_p8), 1, %s895_s19  }
  0x2f   : > { %s609_s23 = sshll.u32 (!%p252_p8), %s257_s13, 2  ;;  %s258_s24 = scalar_lea.sflag (!%p252_p8), [#allocation5], %s257_s13 }
  0x30   : > { %s261_s29 = scalar_lea.vmem [#allocation4], %s609_s23 }
  0x31   : > { %866 = dma.done.wait (%p1021_p7), %s258_s24, 64  }
  0x32   : > { %868 = vsyncadd (%p1021_p7), %s258_s24, 4294967232  ;;  %s268_s28 = scalar_lea.sflag [#allocation8], %s257_s13  ;;  %s271_s12 = scalar_lea.vmem [#allocation7], %s609_s23 }
  0x33   : > { %870 = dma.done.wait (%p1021_p7), %s268_s28, 64  }
  0x34   : > { %872 = vsyncadd (%p1021_p7), %s268_s28, 4294967232  ;;  %s313_s0 = sand.u32 1, %s883_s16   ;;  %p315_p3 = scmp.lt.s32.totalorder %s907_s22, 1 }
  0x35   : > { %p317_p9 = scmp.lt.s32.totalorder %s903_s21, 1  ;;  %s1089_s30 = scalar_lea.vmem [#allocation9], %s313_s0 }
  0x36   : > { %s316_s18 = scalar_select %p315_p3, %s907_s22, 1 }
  0x37   : > { %s318_s26 = scalar_select %p317_p9, %s903_s21, 1 }
  0x38   : > { %s611_s27 = sshll.u32 %s316_s18, 1  ;;  %p613_p7 = scmp.ne.s32.totalorder %s903_s21, 0 }
  0x39   : > { %s320_s5 = sadd.s32 %s611_s27, %s318_s26 }
  0x3a   : > { %s321_s10 = scalar_lea.vmem %s1155_s2, %s320_s5  ;;  %s328_s6 = scalar_lea.vmem %s1156_s3, %s320_s5 }
  0x3b   : > { %333 = sbr.rel (%p613_p7) target bundleno = 67 (0x43), region = 48 }
  0x40   : > { %vm334_vm0 = vcmask 253952   ;;  %v921_v0 = vmov 0.0  }
  0x41   : > { %335 = vst.msk [vmem:[#allocation2] sm:$0x1] %vm334_vm0, %v921_v0 }
  0x42   : > { %336 = vst.msk [vmem:[#allocation3] sm:$0x1] %vm334_vm0, %v921_v0 }
  0x43 PF: > { %v340_v1 = vld [vmem:[%s261_s29] sm:$0xf]  ;;  %vm345_vm1 = vcmask 1043456   ;;  %v366_v2 = vld [vmem:[%s271_s12] sm:$0xf]  ;;  %vm341_vm2 = vcmask 64512  }
  0x44   : > { %v347_v3 = vsel %vm345_vm1, %v340_v1, 0  ;;  %v371_v4 = vsel %vm345_vm1, %v366_v2, 0  ;;  %v337_v5 = vld [vmem:[%s321_s10] sm:$0x1]  ;;  %vm363_vm3 = vcmask 253952   ;;  %p616_p10 = scmp.ne.s32.totalorder %s903_s21, 1 }
  0x45   : > { %356 = vmatpush.bf16.msra.mxu0 %v347_v3  ;;  %380 = vmatpush.bf16.msra.mxu1 %v371_v4  ;;  %v338_v6 = vld [vmem:[%s328_s6] sm:$0x1] }
  0x48   : > { %614 = vmatmul.msk.bf16.vlgmr.msra.gmra.mxu0 %vm341_vm2, %v337_v5  ;;  %615 = vmatmul.msk.bf16.vlgmr.msra.gmra.mxu1 %vm341_vm2, %v338_v6  ;;  %v339_v7 = vld [vmem:[#allocation2] sm:$0x1] }
  0x49   : > { %v365_v8 = vld [vmem:[#allocation3] sm:$0x1] }
  0xc5   : > { %v358_v9 = vpop.f32.mrf.mxu0  ;;  %v382_v10 = vpop.f32.mrf.mxu1 }
  0xc6   : > { %v362_v11 = vadd.f32 %v358_v9, %v339_v7  ;;  %v386_v12 = vadd.f32 %v382_v10, %v365_v8 }
  0xc8   : > { %364 = vst.msk [vmem:[#allocation2] sm:$0x1] %vm363_vm3, %v362_v11 }
  0xc9   : > { %387 = vst.msk [vmem:[#allocation3] sm:$0x1] %vm363_vm3, %v386_v12  ;;  %391 = sbr.rel (%p616_p10) target bundleno = 382 (0x17e), region = 52 }
  0xcd   : > { %v360_v13 = vpop.f32.mrf.mxu0  ;;  %v384_v14 = vpop.f32.mrf.mxu1 }
  0xcf   : > { %v392_v15 = vld [vmem:[#allocation2] sm:$0x1] }
  0xd0   : > { %v394_v16 = vld [vmem:[#allocation3] sm:$0x1]  ;;  %v393_v17 = vmul.f32 0.0625, %v392_v15 }
  0xd1   : > { %v395_v18 = vmul.f32 0.0625, %v394_v16 }
  0xd2   : > { %v400_v19 = vmul.f32 %v393_v17, %v393_v17 }
  0xd3   : > { %v396_v20 = vmul.f32 %v395_v18, %v393_v17  ;;  %v416_v23 = vmul.f32 %v395_v18, %v395_v18 }
  0xd4   : > { %v401_v21 = vsel %vm363_vm3, %v400_v19, 0.0 }
  0xd5   : > { %v397_v22 = vsel %vm363_vm3, %v396_v20, 0.0  ;;  %402 = vadd.xlane.f32.xlu0 %v401_v21  ;;  %v417_v24 = vsel %vm363_vm3, %v416_v23, 0.0 }
  0xd6   : > { %398 = vadd.xlane.f32.xlu1 %v397_v22 }
  0xdd   : > { %418 = vadd.xlane.f32.xlu0 %v417_v24 }
 0x148   : > { %v403_v25 = vpop.xlane.xlu0 %402 }
 0x149   : > { %727 = vrsqrt.f32 %v403_v25  ;;  %vm411_vm4 = vcmp.eq.f32.partialorder %v403_v25, inf  ;;  %v414_v41 = vand.u32 2147483648, %v403_v25  ;;  %vm413_vm5 = vcmp.eq.f32.partialorder %v403_v25, 0.0  ;;  %v399_v58 = vpop.xlane.xlu1 %398 }
 0x14f   : > { %v728_v26 = vpop.eup %727 }
 0x150   : > { %v405_v27 = vmul.f32 %v728_v26, %v403_v25  ;;  %v419_v28 = vpop.xlane.xlu0 %418 }
 0x151   : > { %729 = vrsqrt.f32 %v419_v28  ;;  %vm427_vm6 = vcmp.eq.f32.partialorder %v419_v28, inf  ;;  %v430_v44 = vand.u32 2147483648, %v419_v28  ;;  %vm429_vm7 = vcmp.eq.f32.partialorder %v419_v28, 0.0 }
 0x152   : > { %v406_v29 = vmul.f32 %v728_v26, %v405_v27 }
 0x154   : > { %v407_v30 = vmul.f32 0.5, %v406_v29 }
 0x156   : > { %v408_v31 = vsub.f32 1.5, %v407_v30 }
 0x157   : > { %v730_v32 = vpop.eup %729 }
 0x158   : > { %v409_v33 = vmul.f32 %v728_v26, %v408_v31  ;;  %v421_v34 = vmul.f32 %v730_v32, %v419_v28 }
 0x15a   : > { %v422_v35 = vmul.f32 %v730_v32, %v421_v34  ;;  %v410_v36 = vmul.f32 %v409_v33, %v403_v25 }
 0x15c   : > { %v423_v37 = vmul.f32 0.5, %v422_v35  ;;  %v412_v39 = vsel %vm411_vm4, %v403_v25, %v410_v36 }
 0x15d   : > { %v415_v43 = vsel %vm413_vm5, %v414_v41, %v412_v39 }
 0x15e   : > { %v424_v38 = vsub.f32 1.5, %v423_v37  ;;  %v432_v47 = vmax.f32 %v415_v43, 1e-08 }
 0x160   : > { %v425_v40 = vmul.f32 %v730_v32, %v424_v38 }
 0x162   : > { %v426_v42 = vmul.f32 %v425_v40, %v419_v28 }
 0x164   : > { %v428_v45 = vsel %vm427_vm6, %v419_v28, %v426_v42 }
 0x165   : > { %v431_v46 = vsel %vm429_vm7, %v430_v44, %v428_v45 }
 0x166   : > { %v433_v48 = vmax.f32 %v431_v46, 1e-08 }
 0x168   : > { %v434_v49 = vmul.f32 %v433_v48, %v432_v47 }
 0x16a   : > { %731 = vrcp.f32 %v434_v49  ;;  %v446_v53 = vand.u32 2147483648, %v434_v49  ;;  %v444_v55 = vand.u32 2147483647, %v434_v49  ;;  %vm440_vm9 = vweird.f32 %v434_v49 }
 0x16c   : > { %v447_v57 = vor.u32 1.1754944e-38, %v446_v53  ;;  %vm445_vm11 = vcmp.eq.f32.partialorder %v444_v55, 8.507059e+37 }
 0x170   : > { %v732_v50 = vpop.eup %731 }
 0x171   : > { %v436_v51 = vmul.f32 %v732_v50, %v434_v49  ;;  %vm441_vm8 = vweird.f32 %v732_v50 }
 0x172   : > { %vm442_vm10 = vmor %vm440_vm9, %vm441_vm8 }
 0x173   : > { %v437_v52 = vsub.f32 1.0, %v436_v51 }
 0x175   : > { %v438_v54 = vmul.f32 %v732_v50, %v437_v52 }
 0x177   : > { %v439_v56 = vadd.f32 %v732_v50, %v438_v54 }
 0x179   : > { %v443_v59 = vsel %vm442_vm10, %v732_v50, %v439_v56 }
 0x17a   : > { %v448_v60 = vsel %vm445_vm11, %v447_v57, %v443_v59 }
 0x17b   : > { %v449_v61 = vmul.f32 %v448_v60, %v399_v58 }
 0x17d   : > { %450 = vst [vmem:[%s1089_s30] sm:$0x1] %v449_v61 }
 0x17e PF: > { %s460_s24 = scalar_lea.hbm %s1157_s4, %s907_s22  ;;  %s462_s29 = sshll.u32 %s1089_s30, 4  ;;  %s463_s29 = int_to_ptr.vmem [resolvable:$true] %s462_s29 }
 0x17f   : > { %s464_s28 = sshll.u32 %s460_s24, 4  ;;  %s452_s12 = scalar_lea.sflag [#allocation6], %s313_s0  ;;  %s465_s28 = int_to_ptr.hbm [resolvable:$true] %s464_s28 }
 0x180   : > { %s807_s18 = sshra.s32 %s465_s28, 4  ;;  %s813_s9 = scalar_lea.hbm %s1157_s4, 2  ;;  %s808_s18 = int_to_ptr.hbm [resolvable:$true] %s807_s18 }
 0x181   : > { %s809_s26 = scalar_lea.hbm %s808_s18, 1  ;;  %p814_p1 = scmp.lt.s32.totalorder %s808_s18, %s1157_s4 }
 0x182   : > { %p810_p11 = scmp.ne.s32.totalorder %s808_s18, %s809_s26  ;;  %p815_p4 = scmp.lt.s32.totalorder %s813_s9, %s809_s26 }
 0x184   : > { %p811_p13 = pnand %p810_p11, %p1029_p12  ;;  %p816_p5 = por %p815_p4, %p814_p1 }
 0x186   : > { %p812_p0 = pneg %p811_p13 }
 0x188   : > { %p817_p6 = pnand %p816_p5, %p812_p0 }
 0x18a   : > { %820 = shalt.err (!%p817_p6)
}
 0x18b   : > { %623 = dma.vmem_to_hbm [thread:$0]  (%p1029_p12), %s463_s29, 16, %s465_s28, %s452_s12  }
 0x18c PF: > { %p637_p8 = scmp.ge.s32.totalorder %s919_s25, 2  ;;  %s476_s22 = sand.u32 1, %s879_s15  }
 0x18d   : > { %s477_s0 = scalar_lea.sflag [#allocation6], %s476_s22 }
 0x18e   : > { %p633_p3 = pnand %p637_p8, %p1042_p2 }
 0x190   : > { %p634_p9 = pneg %p633_p3 }
 0x192   : > { %874 = dma.done.wait (%p634_p9), %s477_s0, 16  }
 0x193   : > { %876 = vsyncadd (%p634_p9), %s477_s0, 4294967280  ;;  %s23_s25 = sadd.s32 1, %s919_s25   ;;  %s1175_s7 = sld [smem:[#allocation17_spill]] }
 0x194   : > { %p20_p7 = scmp.ge.s32.totalorder %s23_s25, 6   ;;  %s1176_s11 = sld [smem:[#allocation18_spill]] }
 0x195   : > { %s1177_s21 = sld [smem:[#allocation13_spill]]  ;;  %s1181_s15 = smov %s883_s16 }
 0x196   : > { %s1178_s22 = sld [smem:[#allocation14_spill]]  ;;  %s1182_s16 = smov %s887_s17 }
 0x197   : > { %s1179_s23 = sld [smem:[#allocation15_spill]]  ;;  %s1184_s18 = smov %s895_s19 }
 0x198   : > { %s1180_s24 = sld [smem:[#allocation16_spill]]  ;;  %s1185_s19 = smov %s899_s20 }
 0x199   : > { %s1183_s17 = smov %s1175_s7  ;;  %22 = sbr.rel (!%p20_p7) target bundleno = 13 (0xd), region = 108 }
 0x19a   : > { %s1186_s20 = smov %s1176_s11 }
 0x19e   :  { %482 = vsyncpa [#allocation5], 1 }
 0x19f   :  { %484 = vsyncpa [#allocation5 + $0x1], 1 }
 0x1a0   :  { %485 = vsyncpa [#allocation8], 1 }
 0x1a1   :  { %487 = vsyncpa [#allocation8 + $0x1], 1 }
 0x1a2   :  { %488 = vsyncpa [#allocation6], 1 }
 0x1a3   :  { %490 = vsyncpa [#allocation6 + $0x1], 1 }

</bundles_post_ra>
